<compile_context>
chip_gen: v5e
topology: v5e:2x2
jax: 0.10.0
libtpu: 0.0.40
codegen_flags: <defaults>
</compile_context>

<pallas_src>
import functools

import jax
import jax.numpy as jnp
from jax import lax
from jax.experimental import pallas as pl
from jax.experimental.pallas import tpu as pltpu

EPS = 1e-5


def _round_up(v, m):
    return (v + m - 1) // m * m


def _conv_stats_kernel(x_ref, w_ref, mask_ref, y_ref, psum_ref, pssq_ref, slab_ref,
                       *, C_pad, KH, KW, Wp, Mw_pad):
    # x_ref:    (1, C_pad, L_pad)   flattened zero-padded input for one sample
    # w_ref:    (OC, K)             weights, tap-major / channel-minor, K = KH*KW*C_pad
    # mask_ref: (Mw_pad, 1)         1.0 on valid output columns, 0.0 on wrap/pad columns
    # y_ref:    (1, OC, Mw_pad)     raw "wide" conv output, f32
    # psum_ref: (1, OC, 1)          per-sample per-channel sum   (disjoint blocks -> parallel)
    # pssq_ref: (1, OC, 1)          per-sample per-channel sumsq (disjoint blocks -> parallel)
    # slab_ref: (K, Mw_pad)         VMEM scratch: shifted input slab
    for ki in range(KH):                                # small static unroll (KH*KW taps)
        for kj in range(KW):
            d = ki * Wp + kj                            # static lane offset for this tap
            tap = ki * KW + kj
            slab_ref[tap * C_pad:(tap + 1) * C_pad, :] = x_ref[0, :, d:d + Mw_pad]

    # One big MXU matmul: contraction over all taps*channels at once.
    acc = jnp.dot(w_ref[...], slab_ref[...], preferred_element_type=jnp.float32)  # (OC, Mw_pad)
    y_ref[0] = acc

    # BN partial statistics via MXU matvecs against the validity-mask column.
    mcol = mask_ref[...]                                                     # (Mw_pad, 1)
    psum_ref[0] = jnp.dot(acc, mcol, preferred_element_type=jnp.float32)     # (OC, 1)
    pssq_ref[0] = jnp.dot(acc * acc, mcol, preferred_element_type=jnp.float32)


def _bn_relu_trim_kernel(y_ref, sum_ref, ssq_ref, g_ref, b_ref, o_ref,
                         *, inv_count, eps, OH, OW, Wp):
    # Per-channel scale/shift computed once; one FMA + max per element on the VPU, then the
    # Wp -> OW column compaction is done in VMEM so the HBM store is lane-dense (OH*OW).
    y = y_ref[0]                                         # (OC, Mw_pad)
    mean = sum_ref[...] * inv_count                      # (OC, 1)
    var = jnp.maximum(ssq_ref[...] * inv_count - mean * mean, 0.0)   # biased batch variance
    scale = g_ref[...] * lax.rsqrt(var + eps)            # (OC, 1)
    shift = b_ref[...] - mean * scale
    z = jnp.maximum(y * scale + shift, 0.0)              # (OC, Mw_pad)
    for h in range(OH):                                  # fused trim: drop the Wp-OW wrap cols
        o_ref[0, :, h * OW:(h + 1) * OW] = z[:, h * Wp:h * Wp + OW]


def basic_conv(x, w, gamma, beta, *, stride=1, padding=1, eps=EPS):
    """x: (N, C, H, W) f32; w: (OC, C, KH, KW) f32; gamma/beta: (OC,) f32 -> (N, OC, OH, OW)."""
    # TODO(synk): the flat-shift conv path covers stride=1, dilation=1, groups=1 (the CBAM
    # BasicConv configuration); other strides/dilations/groups are not implemented here.
    assert stride == 1
    N, C, H, W = x.shape
    OC, Cw, KH, KW = w.shape
    assert Cw == C
    Hp, Wp = H + 2 * padding, W + 2 * padding
    OH, OW = Hp - KH + 1, Wp - KW + 1

    C_pad = _round_up(C, 8)                    # sublane-aligned per-tap slab blocks
    Mw = OH * Wp                               # "wide" flattened spatial (incl. wrap columns)
    Mw_pad = _round_up(Mw, 128)                # lane-dense wide axis (multiple of 128)
    Mo = OH * OW                               # compact flattened spatial
    d_max = (KH - 1) * Wp + (KW - 1)           # largest static lane shift
    L0 = Hp * Wp
    L_pad = _round_up(max(L0, d_max + Mw_pad), 128)     # keeps every shifted slice in bounds
    K = KH * KW * C_pad

    x = x.astype(jnp.float32)
    xp = jnp.pad(x, ((0, 0), (0, C_pad - C), (padding, padding), (padding, padding)))
    xflat = jnp.pad(xp.reshape(N, C_pad, L0), ((0, 0), (0, 0), (0, L_pad - L0)))
    wpad = jnp.pad(w.astype(jnp.float32), ((0, 0), (0, C_pad - C), (0, 0), (0, 0)))
    w2 = wpad.transpose(0, 2, 3, 1).reshape(OC, K)       # [oc, tap*C_pad + c]
    j = jnp.arange(Mw_pad, dtype=jnp.int32)
    mask = (((j % Wp) < OW) & (j < Mw)).astype(jnp.float32).reshape(Mw_pad, 1)

    # --- pass 1: wide conv (single matmul) + per-sample BN partial statistics ---
    conv_wide, psum, pssq = pl.pallas_call(
        functools.partial(_conv_stats_kernel, C_pad=C_pad, KH=KH, KW=KW, Wp=Wp, Mw_pad=Mw_pad),
        out_shape=(jax.ShapeDtypeStruct((N, OC, Mw_pad), jnp.float32),
                   jax.ShapeDtypeStruct((N, OC, 1), jnp.float32),
                   jax.ShapeDtypeStruct((N, OC, 1), jnp.float32)),
        grid=(N,),
        in_specs=[
            pl.BlockSpec((1, C_pad, L_pad), lambda n: (n, 0, 0)),
            pl.BlockSpec((OC, K), lambda n: (0, 0)),
            pl.BlockSpec((Mw_pad, 1), lambda n: (0, 0)),
        ],
        out_specs=[
            pl.BlockSpec((1, OC, Mw_pad), lambda n: (n, 0, 0)),
            pl.BlockSpec((1, OC, 1), lambda n: (n, 0, 0)),
            pl.BlockSpec((1, OC, 1), lambda n: (n, 0, 0)),
        ],
        scratch_shapes=[pltpu.VMEM((K, Mw_pad), jnp.float32)],
        compiler_params=pltpu.CompilerParams(dimension_semantics=("parallel",)),
    )(xflat, w2, mask)

    # Tiny cross-batch reduction of the per-sample partials (N*OC floats).
    csum = jnp.sum(psum, axis=0)      # (OC, 1)
    cssq = jnp.sum(pssq, axis=0)      # (OC, 1)

    # --- pass 2: normalize + affine + ReLU + fused column trim (per-sample parallel) ---
    inv_count = 1.0 / float(N * OH * OW)
    out_flat = pl.pallas_call(
        functools.partial(_bn_relu_trim_kernel, inv_count=inv_count, eps=eps,
                          OH=OH, OW=OW, Wp=Wp),
        out_shape=jax.ShapeDtypeStruct((N, OC, Mo), jnp.float32),
        grid=(N,),
        in_specs=[
            pl.BlockSpec((1, OC, Mw_pad), lambda n: (n, 0, 0)),
            pl.BlockSpec((OC, 1), lambda n: (0, 0)),
            pl.BlockSpec((OC, 1), lambda n: (0, 0)),
            pl.BlockSpec((OC, 1), lambda n: (0, 0)),
            pl.BlockSpec((OC, 1), lambda n: (0, 0)),
        ],
        out_specs=pl.BlockSpec((1, OC, Mo), lambda n: (n, 0, 0)),
        compiler_params=pltpu.CompilerParams(dimension_semantics=("parallel",)),
    )(conv_wide, csum, cssq,
      gamma.astype(jnp.float32).reshape(OC, 1),
      beta.astype(jnp.float32).reshape(OC, 1))

    # Output is already NCHW-major and compact; this reshape is free.
    return out_flat.reshape(N, OC, OH, OW)


def reference(x, w, gamma, beta, *, stride=1, padding=1):
    y = lax.conv_general_dilated(
        x, w, window_strides=(stride, stride),
        padding=[(padding, padding), (padding, padding)],
        dimension_numbers=("NCHW", "OIHW", "NCHW"),
    )
    mean = jnp.mean(y, axis=(0, 2, 3), keepdims=True)
    var = jnp.mean(jnp.square(y - mean), axis=(0, 2, 3), keepdims=True)
    y = (y - mean) * lax.rsqrt(var + EPS)
    y = y * gamma.reshape(1, -1, 1, 1) + beta.reshape(1, -1, 1, 1)
    return jnp.maximum(y, 0.0)


if __name__ == "__main__":
    key = jax.random.PRNGKey(0)
    k_x, k_w, k_g, k_b = jax.random.split(key, 4)

    # BasicConv(in_planes=4, out_planes=8, kernel_size=3, stride=1, padding=1)
    N, C, H, W = 2, 4, 16, 16
    OC, KH, KW = 8, 3, 3

    x = jax.random.normal(k_x, (N, C, H, W), dtype=jnp.float32)
    w = 0.1 * jax.random.normal(k_w, (OC, C, KH, KW), dtype=jnp.float32)
    gamma = 1.0 + 0.1 * jax.random.normal(k_g, (OC,), dtype=jnp.float32)
    beta = 0.1 * jax.random.normal(k_b, (OC,), dtype=jnp.float32)

    out = basic_conv(x, w, gamma, beta, stride=1, padding=1)
    out = jax.block_until_ready(out)

    ref = reference(x, w, gamma, beta, stride=1, padding=1)
    assert out.shape == (N, OC, H, W), out.shape
    err = float(jnp.max(jnp.abs(out - ref)))
    assert jnp.allclose(out, ref, rtol=1e-4, atol=1e-4), err

    print("KERNEL_OK")
</pallas_src>

<mosaic_0001>
module attributes {stable_mosaic.version = 11 : i64} {
  func.func @_conv_stats_kernel(%arg0: i32, %arg1: memref<1x8x512xf32, #tpu.memory_space<vmem>>, %arg2: memref<8x72xf32, #tpu.memory_space<vmem>>, %arg3: memref<384x1xf32, #tpu.memory_space<vmem>>, %arg4: memref<1x8x384xf32, #tpu.memory_space<vmem>>, %arg5: memref<1x8x1xf32, #tpu.memory_space<vmem>>, %arg6: memref<1x8x1xf32, #tpu.memory_space<vmem>>, %arg7: memref<72x384xf32, #tpu.memory_space<vmem>>) attributes {dimension_semantics = [#tpu.dimension_semantics<parallel>], iteration_bounds = array<i64: 2>, scalar_prefetch = 0 : i64, scratch_operands = 1 : i64, tpu.core_type = #tpu.core_type<tc>, window_params = [{transform_indices = @transform_0, window_bounds = array<i64: 1, 8, 512>}, {pipeline_mode = #tpu.pipeline_mode<synchronous>, transform_indices = @transform_1, window_bounds = array<i64: 8, 72>}, {pipeline_mode = #tpu.pipeline_mode<synchronous>, transform_indices = @transform_2, window_bounds = array<i64: 384, 1>}, {transform_indices = @transform_3, window_bounds = array<i64: 1, 8, 384>}, {transform_indices = @transform_4, window_bounds = array<i64: 1, 8, 1>}, {transform_indices = @transform_5, window_bounds = array<i64: 1, 8, 1>}]} {
    %c0 = arith.constant 0 : index
    %c0_0 = arith.constant 0 : index
    %c0_1 = arith.constant 0 : index
    %0 = vector.load %arg1[%c0, %c0_0, %c0_1] : memref<1x8x512xf32, #tpu.memory_space<vmem>>, vector<1x8x384xf32>
    %1 = vector.shape_cast %0 : vector<1x8x384xf32> to vector<8x384xf32>
    %c0_2 = arith.constant 0 : index
    %c0_3 = arith.constant 0 : index
    %2 = vector.load %arg7[%c0_2, %c0_3] : memref<72x384xf32, #tpu.memory_space<vmem>>, vector<8x384xf32>
    tpu.vector_store %arg7[%c0_2, %c0_3], %1 {strides = array<i32>} : memref<72x384xf32, #tpu.memory_space<vmem>>, vector<8x384xf32>,
    %c0_4 = arith.constant 0 : index
    %c0_5 = arith.constant 0 : index
    %c1 = arith.constant 1 : index
    %3 = vector.load %arg1[%c0_4, %c0_5, %c1] : memref<1x8x512xf32, #tpu.memory_space<vmem>>, vector<1x8x384xf32>
    %4 = vector.shape_cast %3 : vector<1x8x384xf32> to vector<8x384xf32>
    %c8 = arith.constant 8 : index
    %c0_6 = arith.constant 0 : index
    %5 = vector.load %arg7[%c8, %c0_6] : memref<72x384xf32, #tpu.memory_space<vmem>>, vector<8x384xf32>
    tpu.vector_store %arg7[%c8, %c0_6], %4 {strides = array<i32>} : memref<72x384xf32, #tpu.memory_space<vmem>>, vector<8x384xf32>,
    %c0_7 = arith.constant 0 : index
    %c0_8 = arith.constant 0 : index
    %c2 = arith.constant 2 : index
    %6 = vector.load %arg1[%c0_7, %c0_8, %c2] : memref<1x8x512xf32, #tpu.memory_space<vmem>>, vector<1x8x384xf32>
    %7 = vector.shape_cast %6 : vector<1x8x384xf32> to vector<8x384xf32>
    %c16 = arith.constant 16 : index
    %c0_9 = arith.constant 0 : index
    %8 = vector.load %arg7[%c16, %c0_9] : memref<72x384xf32, #tpu.memory_space<vmem>>, vector<8x384xf32>
    tpu.vector_store %arg7[%c16, %c0_9], %7 {strides = array<i32>} : memref<72x384xf32, #tpu.memory_space<vmem>>, vector<8x384xf32>,
    %c0_10 = arith.constant 0 : index
    %c0_11 = arith.constant 0 : index
    %c18 = arith.constant 18 : index
    %9 = vector.load %arg1[%c0_10, %c0_11, %c18] : memref<1x8x512xf32, #tpu.memory_space<vmem>>, vector<1x8x384xf32>
    %10 = vector.shape_cast %9 : vector<1x8x384xf32> to vector<8x384xf32>
    %c24 = arith.constant 24 : index
    %c0_12 = arith.constant 0 : index
    %11 = vector.load %arg7[%c24, %c0_12] : memref<72x384xf32, #tpu.memory_space<vmem>>, vector<8x384xf32>
    tpu.vector_store %arg7[%c24, %c0_12], %10 {strides = array<i32>} : memref<72x384xf32, #tpu.memory_space<vmem>>, vector<8x384xf32>,
    %c0_13 = arith.constant 0 : index
    %c0_14 = arith.constant 0 : index
    %c19 = arith.constant 19 : index
    %12 = vector.load %arg1[%c0_13, %c0_14, %c19] : memref<1x8x512xf32, #tpu.memory_space<vmem>>, vector<1x8x384xf32>
    %13 = vector.shape_cast %12 : vector<1x8x384xf32> to vector<8x384xf32>
    %c32 = arith.constant 32 : index
    %c0_15 = arith.constant 0 : index
    %14 = vector.load %arg7[%c32, %c0_15] : memref<72x384xf32, #tpu.memory_space<vmem>>, vector<8x384xf32>
    tpu.vector_store %arg7[%c32, %c0_15], %13 {strides = array<i32>} : memref<72x384xf32, #tpu.memory_space<vmem>>, vector<8x384xf32>,
    %c0_16 = arith.constant 0 : index
    %c0_17 = arith.constant 0 : index
    %c20 = arith.constant 20 : index
    %15 = vector.load %arg1[%c0_16, %c0_17, %c20] : memref<1x8x512xf32, #tpu.memory_space<vmem>>, vector<1x8x384xf32>
    %16 = vector.shape_cast %15 : vector<1x8x384xf32> to vector<8x384xf32>
    %c40 = arith.constant 40 : index
    %c0_18 = arith.constant 0 : index
    %17 = vector.load %arg7[%c40, %c0_18] : memref<72x384xf32, #tpu.memory_space<vmem>>, vector<8x384xf32>
    tpu.vector_store %arg7[%c40, %c0_18], %16 {strides = array<i32>} : memref<72x384xf32, #tpu.memory_space<vmem>>, vector<8x384xf32>,
    %c0_19 = arith.constant 0 : index
    %c0_20 = arith.constant 0 : index
    %c36 = arith.constant 36 : index
    %18 = vector.load %arg1[%c0_19, %c0_20, %c36] : memref<1x8x512xf32, #tpu.memory_space<vmem>>, vector<1x8x384xf32>
    %19 = vector.shape_cast %18 : vector<1x8x384xf32> to vector<8x384xf32>
    %c48 = arith.constant 48 : index
    %c0_21 = arith.constant 0 : index
    %20 = vector.load %arg7[%c48, %c0_21] : memref<72x384xf32, #tpu.memory_space<vmem>>, vector<8x384xf32>
    tpu.vector_store %arg7[%c48, %c0_21], %19 {strides = array<i32>} : memref<72x384xf32, #tpu.memory_space<vmem>>, vector<8x384xf32>,
    %c0_22 = arith.constant 0 : index
    %c0_23 = arith.constant 0 : index
    %c37 = arith.constant 37 : index
    %21 = vector.load %arg1[%c0_22, %c0_23, %c37] : memref<1x8x512xf32, #tpu.memory_space<vmem>>, vector<1x8x384xf32>
    %22 = vector.shape_cast %21 : vector<1x8x384xf32> to vector<8x384xf32>
    %c56 = arith.constant 56 : index
    %c0_24 = arith.constant 0 : index
    %23 = vector.load %arg7[%c56, %c0_24] : memref<72x384xf32, #tpu.memory_space<vmem>>, vector<8x384xf32>
    tpu.vector_store %arg7[%c56, %c0_24], %22 {strides = array<i32>} : memref<72x384xf32, #tpu.memory_space<vmem>>, vector<8x384xf32>,
    %c0_25 = arith.constant 0 : index
    %c0_26 = arith.constant 0 : index
    %c38 = arith.constant 38 : index
    %24 = vector.load %arg1[%c0_25, %c0_26, %c38] : memref<1x8x512xf32, #tpu.memory_space<vmem>>, vector<1x8x384xf32>
    %25 = vector.shape_cast %24 : vector<1x8x384xf32> to vector<8x384xf32>
    %c64 = arith.constant 64 : index
    %c0_27 = arith.constant 0 : index
    %26 = vector.load %arg7[%c64, %c0_27] : memref<72x384xf32, #tpu.memory_space<vmem>>, vector<8x384xf32>
    tpu.vector_store %arg7[%c64, %c0_27], %25 {strides = array<i32>} : memref<72x384xf32, #tpu.memory_space<vmem>>, vector<8x384xf32>,
    %c0_28 = arith.constant 0 : index
    %c0_29 = arith.constant 0 : index
    %27 = vector.load %arg2[%c0_28, %c0_29] : memref<8x72xf32, #tpu.memory_space<vmem>>, vector<8x72xf32>
    %c0_30 = arith.constant 0 : index
    %c0_31 = arith.constant 0 : index
    %28 = vector.load %arg7[%c0_30, %c0_31] : memref<72x384xf32, #tpu.memory_space<vmem>>, vector<72x384xf32>
    %cst = arith.constant dense<0.000000e+00> : vector<8x384xf32>
    %29 = tpu.matmul %27, %28, %cst {dimension_numbers = #tpu.dot_dimension_numbers<[1], [0], [0], [1], [0, 0, 1, 1], [], []>} : vector<8x72xf32>, vector<72x384xf32>, vector<8x384xf32> -> vector<8x384xf32>
    %c0_32 = arith.constant 0 : index
    %c0_33 = arith.constant 0 : index
    %c0_34 = arith.constant 0 : index
    %30 = vector.load %arg4[%c0_32, %c0_33, %c0_34] : memref<1x8x384xf32, #tpu.memory_space<vmem>>, vector<1x8x384xf32>
    %31 = vector.shape_cast %30 : vector<1x8x384xf32> to vector<8x384xf32>
    %32 = vector.shape_cast %29 : vector<8x384xf32> to vector<1x8x384xf32>
    tpu.vector_store %arg4[%c0_32, %c0_33, %c0_34], %32 {strides = array<i32>} : memref<1x8x384xf32, #tpu.memory_space<vmem>>, vector<1x8x384xf32>,
    %c0_35 = arith.constant 0 : index
    %c0_36 = arith.constant 0 : index
    %33 = vector.load %arg3[%c0_35, %c0_36] : memref<384x1xf32, #tpu.memory_space<vmem>>, vector<384x1xf32>
    %cst_37 = arith.constant dense<0.000000e+00> : vector<8x1xf32>
    %34 = tpu.matmul %29, %33, %cst_37 {dimension_numbers = #tpu.dot_dimension_numbers<[1], [0], [0], [1], [0, 0, 1, 1], [], []>} : vector<8x384xf32>, vector<384x1xf32>, vector<8x1xf32> -> vector<8x1xf32>
    %c0_38 = arith.constant 0 : index
    %c0_39 = arith.constant 0 : index
    %c0_40 = arith.constant 0 : index
    %35 = vector.load %arg5[%c0_38, %c0_39, %c0_40] : memref<1x8x1xf32, #tpu.memory_space<vmem>>, vector<1x8x1xf32>
    %36 = vector.shape_cast %35 : vector<1x8x1xf32> to vector<8x1xf32>
    %37 = vector.shape_cast %34 : vector<8x1xf32> to vector<1x8x1xf32>
    tpu.vector_store %arg5[%c0_38, %c0_39, %c0_40], %37 {strides = array<i32>} : memref<1x8x1xf32, #tpu.memory_space<vmem>>, vector<1x8x1xf32>,
    %38 = arith.mulf %29, %29 : vector<8x384xf32>
    %cst_41 = arith.constant dense<0.000000e+00> : vector<8x1xf32>
    %39 = tpu.matmul %38, %33, %cst_41 {dimension_numbers = #tpu.dot_dimension_numbers<[1], [0], [0], [1], [0, 0, 1, 1], [], []>} : vector<8x384xf32>, vector<384x1xf32>, vector<8x1xf32> -> vector<8x1xf32>
    %c0_42 = arith.constant 0 : index
    %c0_43 = arith.constant 0 : index
    %c0_44 = arith.constant 0 : index
    %40 = vector.load %arg6[%c0_42, %c0_43, %c0_44] : memref<1x8x1xf32, #tpu.memory_space<vmem>>, vector<1x8x1xf32>
    %41 = vector.shape_cast %40 : vector<1x8x1xf32> to vector<8x1xf32>
    %42 = vector.shape_cast %39 : vector<8x1xf32> to vector<1x8x1xf32>
    tpu.vector_store %arg6[%c0_42, %c0_43, %c0_44], %42 {strides = array<i32>} : memref<1x8x1xf32, #tpu.memory_space<vmem>>, vector<1x8x1xf32>,
    return
  }
  func.func @transform_0(%arg0: i32) -> (i32, i32, i32) {
    %c0_i32 = arith.constant 0 : i32
    %c0_i32_0 = arith.constant 0 : i32
    %c0_i32_1 = arith.constant 0 : i32
    return %arg0, %c0_i32, %c0_i32_0 : i32, i32, i32
  }
  func.func @transform_1(%arg0: i32) -> (i32, i32) {
    %c0_i32 = arith.constant 0 : i32
    %c0_i32_0 = arith.constant 0 : i32
    %c0_i32_1 = arith.constant 0 : i32
    return %c0_i32, %c0_i32_0 : i32, i32
  }
  func.func @transform_2(%arg0: i32) -> (i32, i32) {
    %c0_i32 = arith.constant 0 : i32
    %c0_i32_0 = arith.constant 0 : i32
    %c0_i32_1 = arith.constant 0 : i32
    return %c0_i32, %c0_i32_0 : i32, i32
  }
  func.func @transform_3(%arg0: i32) -> (i32, i32, i32) {
    %c0_i32 = arith.constant 0 : i32
    %c0_i32_0 = arith.constant 0 : i32
    %c0_i32_1 = arith.constant 0 : i32
    return %arg0, %c0_i32, %c0_i32_0 : i32, i32, i32
  }
  func.func @transform_4(%arg0: i32) -> (i32, i32, i32) {
    %c0_i32 = arith.constant 0 : i32
    %c0_i32_0 = arith.constant 0 : i32
    %c0_i32_1 = arith.constant 0 : i32
    return %arg0, %c0_i32, %c0_i32_0 : i32, i32, i32
  }
  func.func @transform_5(%arg0: i32) -> (i32, i32, i32) {
    %c0_i32 = arith.constant 0 : i32
    %c0_i32_0 = arith.constant 0 : i32
    %c0_i32_1 = arith.constant 0 : i32
    return %arg0, %c0_i32, %c0_i32_0 : i32, i32, i32
  }
}

</mosaic_0001>

<bundles_post_ra>
// kernel: tpu_custom_call.1
= control target key start
LH: loop header
LB: loop body
LE: loop exit
PB: predicated region body
PF: predicated region fallthrough
CT: control target
= control target key end

     0   :  { %11 = vsyncpa [#allocation4], 0  ;;  %s1601_s0 = inlined_call_operand.vmem [shape: f32[2,8,512], index: 0, kind: input, shape index: {}]   ;;  %s1602_s1 = inlined_call_operand.vmem [shape: f32[8,72], index: 1, kind: input, shape index: {}]   ;;  %s1603_s2 = inlined_call_operand.vmem [shape: f32[384,1], index: 2, kind: input, shape index: {}]   ;;  %s1604_s3 = inlined_call_operand.hbm [shape: f32[2,8,384], index: 3, kind: output, shape index: {0}]   ;;  %s1605_s4 = inlined_call_operand.vmem [shape: f32[2,8,1], index: 4, kind: output, shape index: {1}]   ;;  %s1606_s5 = inlined_call_operand.vmem [shape: f32[2,8,1], index: 5, kind: output, shape index: {2}]  }
   0x1   :  { %13 = vsyncpa [#allocation4 + $0x1], 0  ;;  %s1111_s18 = smov 0   ;;  %s1113_s19 = smov 0  }
   0x2   :  { %s1115_s20 = smov 0   ;;  %s1117_s21 = smov 0  }
   0x3 LB: > { %s1132_s22 = sadd.s32 4294967295, %s1071_s21   ;;  %s865_s23 = sadd.s32 4294967294, %s1071_s21   ;;  %s1071_s21 = sphi %s1117_s21, %s1612_s21   ;;  %s1067_s20 = sphi %s1115_s20, %s1611_s20   ;;  %s1063_s19 = sphi %s1113_s19, %s1610_s19   ;;  %s1059_s18 = sphi %s1111_s18, %s1609_s18  }
   0x4   : > { %s1136_s24 = sadd.s32 1, %s1071_s21   ;;  %s94_s25 = sadd.s32 1, %s1067_s20 }
   0x5   : > { %s91_s26 = ssub.s32 %s1071_s21, %s1136_s24  ;;  %p104_p0 = scmp.ne.s32.totalorder %s1067_s20, %s1063_s19 }
   0x6   : > { %p92_p1 = scmp.eq.s32.totalorder %s91_s26, 0  ;;  %p105_p2 = scmp.eq.s32.totalorder %s1132_s22, 1 }
   0x7   : > { %p110_p3 = scmp.ne.s32.totalorder %s1063_s19, %s1059_s18  ;;  %p111_p4 = scmp.eq.s32.totalorder %s865_s23, 1 }
   0x8   : > { %s1147_s27 = scalar_select %p92_p1, %s1067_s20, %s94_s25  }
   0x9   : > { %p1149_p5 = por %p105_p2, %p104_p0  ;;  %p1153_p6 = por %p111_p4, %p110_p3 }
   0xa   : > { %p868_p7 = scmp.ge.s32.totalorder %s1071_s21, 1  ;;  %p195_p8 = scmp.lt.s32.totalorder %s1071_s21, 3 }
   0xc   : > { %p196_p9 = pnand %p868_p7, %p195_p8 }
   0xd   : > { %p231_p10 = scmp.lt.s32.totalorder (!%p196_p9), %s1132_s22, 1  ;;  %s1073_s10 = smov (!%p196_p9), 90  }
   0xe   : > { %199 = sbr.rel (%p196_p9) target bundleno = 454 (0x1c6), region = 32  ;;  %s1074_s11 = smov (!%p196_p9), 92  }
   0xf   : > { %s1075_s12 = smov (!%p196_p9), 109   ;;  %s1076_s13 = smov (!%p196_p9), 91  }
  0x10   : > { %s1077_s14 = smov (!%p196_p9), 108   ;;  %s1078_s15 = smov (!%p196_p9), 110  }
  0x11   : > { %s1079_s16 = smov (!%p196_p9), 126   ;;  %s1080_s17 = smov (!%p196_p9), 127  }
  0x13   : > { %s1161_s30 = scalar_select %p231_p10, %s1132_s22, 1  ;;  %vm448_vm0 = vcmask 736256   ;;  %vm422_vm1 = vcmask 744448   ;;  %vm396_vm2 = vcmask 752640   ;;  %vm370_vm3 = vcmask 883712   ;;  %v1229_v35 = vld [vmem:[%s1603_s2 + $0x78] sm:$0xff] }
  0x14   : > { %vm344_vm4 = vcmask 891904   ;;  %vm318_vm5 = vcmask 900096   ;;  %vm292_vm6 = vcmask 1031168   ;;  %v1234_v36 = vld [vmem:[%s1603_s2 + $0x70] sm:$0xff]  ;;  %601 = vmatpush.msra.mxu3 %v1229_v35  ;;  %v1244_v41 = vld [vmem:[%s1603_s2 + $0xf8] sm:$0xff]  ;;  %v1249_v42 = vld [vmem:[%s1603_s2 + $0x68] sm:$0xff] }
  0x15   : > { %s879_s6 = sshll.u32 %s1161_s30, 5  ;;  %621 = vmatpush.msra.mxu0 %v1244_v41  ;;  %v1255_v43 = vld [vmem:[%s1603_s2 + $0xf0] sm:$0xff]  ;;  %v1270_v47 = vld [vmem:[%s1603_s2 + $0x60] sm:$0xff]  ;;  %v1275_v48 = vld [vmem:[%s1603_s2 + $0xe8] sm:$0xff]  ;;  %vm266_vm7 = vcmask 1039360   ;;  %vm486_vm8 = vcmask 588800  }
  0x16   : > { %s235_s9 = scalar_lea.vmem %s1601_s0, %s879_s6  ;;  %602 = vmatpush.msra.mxu3 %v1234_v36  ;;  %v1284_v50 = vld [vmem:[%s1603_s2 + $0x58] sm:$0xff]  ;;  %v1289_v51 = vld [vmem:[%s1603_s2 + $0xe0] sm:$0xff]  ;;  %v1300_v56 = vld [vmem:[%s1603_s2 + $0x50] sm:$0xff] }
  0x17   : > { %v1167_v0 = vld [vmem:[%s235_s9] sm:$0xff]  ;;  %v1169_v1 = vld [vmem:[%s235_s9 + $0x8] sm:$0xff]  ;;  %v1173_v3 = vld [vmem:[%s235_s9 + $0x10] sm:$0xff]  ;;  %622 = vmatpush.msra.mxu0 %v1255_v43 }
  0x18   : > { %v929_v2 = vpack.i.bf16 %v1169_v1, %v1167_v0  ;;  %v409_v4 = vld [vmem:[%s235_s9 + $0x18] sm:$0xff]  ;;  %603 = vmatpush.msra.mxu3 %v1249_v42  ;;  %v1314_v62 = vld [vmem:[%s1603_s2 + $0x48] sm:$0xff]  ;;  %v1319_v63 = vld [vmem:[%s1603_s2 + $0xd0] sm:$0xff] }
  0x19   : > { %v964_v5 = vpack.i.bf16 %v409_v4, %v1173_v3  ;;  %623 = vmatpush.msra.mxu0 %v1275_v48  ;;  %v1305_v57 = vld [vmem:[%s1603_s2 + $0xd8] sm:$0xff] }
  0x1a   : > { %930 = vrot.lane.b32.xlu0 %v929_v2, %s1073_s10  ;;  %940 = vrot.lane.b32.xlu1 %v929_v2, %s1074_s11 }
  0x1b   : > { %950 = vrot.lane.b32.xlu2 %v929_v2, %s1075_s12  ;;  %604 = vmatpush.msra.mxu3 %v1270_v47 }
  0x1c   : > { %624 = vmatpush.msra.mxu0 %v1289_v51 }
  0x1d   : > { %605 = vmatpush.msra.mxu3 %v1284_v50 }
  0x1e   : > { %625 = vmatpush.msra.mxu0 %v1305_v57 }
  0x1f   : > { %606 = vmatpush.msra.mxu3 %v1300_v56 }
  0x20   : > { %626 = vmatpush.msra.mxu0 %v1319_v63 }
  0x21   : > { %607 = vmatpush.msra.mxu3 %v1314_v62 }
  0x22   : > { %935 = vrot.lane.b32.xlu0 %v929_v2, %s1076_s13  ;;  %945 = vrot.lane.b32.xlu1 %v929_v2, %s1077_s14 }
  0x23   : > { %955 = vrot.lane.b32.xlu2 %v964_v5, %s1073_s10 }
  0x2a   : > { %965 = vrot.lane.b32.xlu1 %v964_v5, %s1076_s13  ;;  %960 = vrot.lane.b32.xlu0 %v929_v2, %s1078_s15 }
  0x2b   : > { %970 = vrot.lane.b32.xlu2 %v929_v2, %s1079_s16 }
  0x32   : > { %975 = vrot.lane.b32.xlu0 %v964_v5, %s1074_s11  ;;  %980 = vrot.lane.b32.xlu1 %v929_v2, %s1080_s17  ;;  %s216_s11 = sand.u32 1, %s1063_s19  }
  0x33   : > { %985 = vrot.lane.b32.xlu2 %v964_v5, %s1077_s14  ;;  %s881_s14 = smul.u32 24, %s1132_s22  ;;  %s728_s26 = scalar_lea.sflag [#allocation4], %s216_s11 }
  0x34   : > { %s1029_s22 = scalar_lea.hbm %s1604_s3, 48 }
  0x3a   : > { %990 = vrot.lane.b32.xlu0 %v964_v5, %s1075_s12  ;;  %995 = vrot.lane.b32.xlu1 %v964_v5, %s1078_s15  ;;  %s880_s12 = smul.u32 24, %s216_s11 }
  0x3b   : > { %1000 = vrot.lane.b32.xlu2 %v964_v5, %s1079_s16 }
  0x3c   : > { %s218_s13 = scalar_lea.vmem [#allocation3], %s880_s12 }
  0x3d   : > { %s749_s23 = sshll.u32 %s218_s13, 4  ;;  %s750_s23 = int_to_ptr.vmem [resolvable:$true] %s749_s23 }
  0x42   : > { %1005 = vrot.lane.b32.xlu0 %v964_v5, %s1080_s17  ;;  %s747_s17 = scalar_lea.hbm %s1604_s3, %s881_s14 }
  0x43   : > { %s751_s25 = sshll.u32 %s747_s17, 4  ;;  %s752_s25 = int_to_ptr.hbm [resolvable:$true] %s751_s25 }
  0x44   : > { %s1023_s6 = sshra.s32 %s752_s25, 4  ;;  %s1024_s6 = int_to_ptr.hbm [resolvable:$true] %s1023_s6 }
  0x45   : > { %s1025_s7 = scalar_lea.hbm %s1024_s6, 24  ;;  %p1030_p0 = scmp.lt.s32.totalorder %s1024_s6, %s1604_s3 }
  0x46   : > { %p1026_p11 = scmp.ne.s32.totalorder %s1024_s6, %s1025_s7  ;;  %p1031_p1 = scmp.lt.s32.totalorder %s1029_s22, %s1025_s7 }
  0x48   : > { %p1027_p12 = pnand %p1026_p11, %p1149_p5  ;;  %p1032_p2 = por %p1031_p1, %p1030_p0 }
  0x4a   : > { %p1028_p13 = pneg %p1027_p12 }
  0x4c   : > { %p1033_p3 = pnand %p1032_p2, %p1028_p13 }
  0x75   : > { %v1176_v6 = vpop.permute.xlu2 %950 }
  0x76   : > { %v953_v26 = vunpack.i.h.bf16 %v1176_v6  ;;  %v952_v27 = vunpack.i.l.bf16 %v1176_v6 }
  0x78   : > { %v345_v34 = vsel %vm344_vm4, %v952_v27, %v953_v26 }
  0x7d   : > { %v1178_v7 = vpop.permute.xlu2 %955 }
  0x7e   : > { %v958_v8 = vunpack.i.h.bf16 %v1178_v7  ;;  %v957_v9 = vunpack.i.l.bf16 %v1178_v7 }
  0x80   : > { %v451_v10 = vsel %vm448_vm0, %v957_v9, %v958_v8  ;;  %v1331_v8 = vld [vmem:[%s1603_s2 + $0x40] sm:$0xff] }
  0x81   : > { %537 = vmatpush.msra.mxu2 %v451_v10  ;;  %v1336_v10 = vld [vmem:[%s1602_s1] sm:$0xff]  ;;  %608 = vmatpush.msra.mxu3 %v1331_v8 }
  0x85   : > { %v1202_v22 = vpop.permute.xlu2 %970 }
  0x86   : > { %v973_v29 = vunpack.i.h.bf16 %v1202_v22  ;;  %v972_v30 = vunpack.i.l.bf16 %v1202_v22  ;;  %v1454_v22 = vld [vmem:[%s1603_s2 + $0x8] sm:$0xff] }
  0x88   : > { %v293_v46 = vsel %vm292_vm6, %v972_v30, %v973_v29  ;;  %v1374_v30 = vld [vmem:[%s1603_s2 + $0x30] sm:$0xff] }
  0x8c   : > { %v1185_v11 = vpop.permute.xlu0 %930  ;;  %v1187_v12 = vpop.permute.xlu1 %940 }
  0x8d   : > { %v933_v13 = vunpack.i.h.bf16 %v1185_v11  ;;  %v932_v14 = vunpack.i.l.bf16 %v1185_v11  ;;  %v943_v18 = vunpack.i.h.bf16 %v1187_v12  ;;  %v942_v19 = vunpack.i.l.bf16 %v1187_v12  ;;  %v1277_v49 = vpop.permute.xlu2 %985 }
  0x8e   : > { %v988_v52 = vunpack.i.h.bf16 %v1277_v49  ;;  %v987_v53 = vunpack.i.l.bf16 %v1277_v49 }
  0x8f   : > { %v449_v15 = vsel %vm448_vm0, %v932_v14, %v933_v13  ;;  %v397_v28 = vsel %vm396_vm2, %v942_v19, %v943_v18  ;;  %v1343_v14 = vld [vmem:[%s1603_s2 + $0xc8] sm:$0xff]  ;;  %v1354_v19 = vld [vmem:[%s1603_s2 + $0x38] sm:$0xff] }
  0x90   : > { %497 = vmatpush.msra.mxu1 %v449_v15  ;;  %v373_v5 = vsel %vm370_vm3, %v987_v53, %v988_v52  ;;  %v450_v15 = vsel %vm448_vm0, %v933_v13, %v957_v9  ;;  %627 = vmatpush.msra.mxu0 %v1343_v14  ;;  %v1435_v52 = vld [vmem:[%s1603_s2 + $0x10] sm:$0xff] }
  0x91   : > { %609 = vmatpush.msra.mxu3 %v1354_v19 }
  0x93   : > { %610 = vmatpush.msra.mxu3 %v1374_v30 }
  0x94   : > { %v1194_v16 = vpop.permute.xlu0 %935  ;;  %v1196_v17 = vpop.permute.xlu1 %945 }
  0x95   : > { %v938_v20 = vunpack.i.h.bf16 %v1194_v16  ;;  %v937_v21 = vunpack.i.l.bf16 %v1194_v16  ;;  %v948_v23 = vunpack.i.h.bf16 %v1196_v17  ;;  %v947_v24 = vunpack.i.l.bf16 %v1196_v17 }
  0x97   : > { %v423_v25 = vsel %vm422_vm1, %v937_v21, %v938_v20  ;;  %v371_v31 = vsel %vm370_vm3, %v947_v24, %v948_v23  ;;  %v1001_v21 = vpop.permute.xlu2 %1000  ;;  %v372_v12 = vsel %vm370_vm3, %v948_v23, %v987_v53  ;;  %v1415_v23 = vld [vmem:[%s1603_s2 + $0xa8] sm:$0xff] }
  0x98   : > { %498 = vmatpush.msra.mxu1 %v423_v25  ;;  %v1003_v7 = vunpack.i.h.bf16 %v1001_v21 }
  0x9a   : > { %499 = vmatpush.msra.mxu1 %v397_v28 }
  0x9c   : > { %v1219_v32 = vpop.permute.xlu1 %965  ;;  %500 = vmatpush.msra.mxu1 %v371_v31  ;;  %v1221_v33 = vpop.permute.xlu0 %960  ;;  %v1002_v31 = vunpack.i.l.bf16 %v1001_v21 }
  0x9d   : > { %v968_v37 = vunpack.i.h.bf16 %v1219_v32  ;;  %v967_v38 = vunpack.i.l.bf16 %v1219_v32  ;;  %v963_v39 = vunpack.i.h.bf16 %v1221_v33  ;;  %v962_v40 = vunpack.i.l.bf16 %v1221_v33 }
  0x9e   : > { %501 = vmatpush.msra.mxu1 %v345_v34  ;;  %v294_v33 = vsel %vm292_vm6, %v973_v29, %v1002_v31  ;;  %v1464_v29 = vld [vmem:[%s1603_s2] sm:$0xff] }
  0x9f   : > { %v425_v44 = vsel %vm422_vm1, %v967_v38, %v968_v37  ;;  %v319_v45 = vsel %vm318_vm5, %v962_v40, %v963_v39  ;;  %v424_v9 = vsel %vm422_vm1, %v938_v20, %v967_v38  ;;  %v1383_v20 = vld [vmem:[%s1603_s2 + $0xb8] sm:$0xff]  ;;  %v1390_v37 = vld [vmem:[%s1603_s2 + $0x28] sm:$0xff]  ;;  %v295_v38 = vsel %vm292_vm6, %v1002_v31, %v1003_v7  ;;  %v1405_v40 = vld [vmem:[%s1603_s2 + $0x20] sm:$0xff] }
  0xa0   : > { %538 = vmatpush.msra.mxu2 %v425_v44  ;;  %502 = vmatpush.msra.mxu1 %v319_v45  ;;  %v1420_v44 = vld [vmem:[%s1603_s2 + $0x18] sm:$0xff] }
  0xa1   : > { %611 = vmatpush.msra.mxu3 %v1390_v37 }
  0xa2   : > { %503 = vmatpush.msra.mxu1 %v293_v46 }
  0xa3   : > { %612 = vmatpush.msra.mxu3 %v1405_v40 }
  0xa4   : > { %v976_v54 = vpop.permute.xlu0 %975  ;;  %v1295_v55 = vpop.permute.xlu1 %980 }
  0xa5   : > { %v978_v58 = vunpack.i.h.bf16 %v976_v54  ;;  %v977_v59 = vunpack.i.l.bf16 %v976_v54  ;;  %v983_v60 = vunpack.i.h.bf16 %v1295_v55  ;;  %v982_v61 = vunpack.i.l.bf16 %v1295_v55  ;;  %613 = vmatpush.msra.mxu3 %v1420_v44  ;;  %v1469_v55 = vld [vmem:[%s1603_s2 + $0x90] sm:$0xff] }
  0xa7   : > { %v267_v2 = vsel %vm266_vm7, %v982_v61, %v983_v60  ;;  %v399_v4 = vsel %vm396_vm2, %v977_v59, %v978_v58  ;;  %v398_v16 = vsel %vm396_vm2, %v943_v18, %v977_v59  ;;  %v1399_v18 = vld [vmem:[%s1603_s2 + $0xb0] sm:$0xff]  ;;  %614 = vmatpush.msra.mxu3 %v1435_v52  ;;  %v570_v58 = vld [vmem:[%s1603_s2 + $0x88] sm:$0xff]  ;;  %v588_v59 = vld [vmem:[%s1603_s2 + $0x118] sm:$0xff] }
  0xa8   : > { %504 = vmatpush.msra.mxu1 %v267_v2  ;;  %539 = vmatpush.msra.mxu2 %v399_v4  ;;  %v586_v61 = vld [vmem:[%s1603_s2 + $0x108] sm:$0xff] }
  0xa9   : > { %615 = vmatpush.msra.mxu3 %v1454_v22 }
  0xaa   : > { %505 = vmatpush.msra.mxu1 %v1167_v0  ;;  %540 = vmatpush.msra.mxu2 %v373_v5  ;;  %v1360_v0 = vld [vmem:[%s1603_s2 + $0xc0] sm:$0xff] }
  0xab   : > { %873 = vmatmul.msk.f32.vlgmr.msra.gmra.mxu1 %vm486_vm8, %v1336_v10  ;;  %628 = vmatpush.msra.mxu0 %v1360_v0 }
  0xac   : > { %517 = vmatpush.msrb.mxu1 %v450_v15  ;;  %v991_v24 = vpop.permute.xlu0 %990  ;;  %v996_v11 = vpop.permute.xlu1 %995  ;;  %616 = vmatpush.msra.mxu3 %v1464_v29 }
  0xad   : > { %v993_v13 = vunpack.i.h.bf16 %v991_v24  ;;  %v992_v25 = vunpack.i.l.bf16 %v991_v24  ;;  %v998_v27 = vunpack.i.h.bf16 %v996_v11  ;;  %v997_v28 = vunpack.i.l.bf16 %v996_v11  ;;  %629 = vmatpush.msra.mxu0 %v1383_v20 }
  0xae   : > { %518 = vmatpush.msrb.mxu1 %v424_v9  ;;  %686 = vmatpush.msrb.mxu3 %v1244_v41  ;;  %v597_v41 = vld [vmem:[%s1603_s2 + $0x160] sm:$0xff] }
  0xaf   : > { %v347_v32 = vsel %vm344_vm4, %v992_v25, %v993_v13  ;;  %v321_v34 = vsel %vm318_vm5, %v997_v28, %v998_v27  ;;  %v346_v17 = vsel %vm344_vm4, %v953_v26, %v992_v25  ;;  %630 = vmatpush.msra.mxu0 %v1399_v18  ;;  %v320_v6 = vsel %vm318_vm5, %v963_v39, %v997_v28  ;;  %v1430_v26 = vld [vmem:[%s1603_s2 + $0xa0] sm:$0xff]  ;;  %v1445_v39 = vld [vmem:[%s1603_s2 + $0x98] sm:$0xff] }
  0xb0   : > { %519 = vmatpush.msrb.mxu1 %v398_v16  ;;  %541 = vmatpush.msra.mxu2 %v347_v32 }
  0xb1   : > { %631 = vmatpush.msra.mxu0 %v1415_v23  ;;  %687 = vmatpush.msrb.mxu3 %v1255_v43  ;;  %v595_v43 = vld [vmem:[%s1603_s2 + $0x150] sm:$0xff] }
  0xb2   : > { %520 = vmatpush.msrb.mxu1 %v372_v12  ;;  %542 = vmatpush.msra.mxu2 %v321_v34 }
  0xb3   : > { %632 = vmatpush.msra.mxu0 %v1430_v26  ;;  %688 = vmatpush.msrb.mxu3 %v1275_v48  ;;  %v593_v48 = vld [vmem:[%s1603_s2 + $0x140] sm:$0xff] }
  0xb4   : > { %521 = vmatpush.msrb.mxu1 %v346_v17  ;;  %v1006_v45 = vpop.permute.xlu0 %1005  ;;  %543 = vmatpush.msra.mxu2 %v295_v38 }
  0xb5   : > { %v1008_v46 = vunpack.i.h.bf16 %v1006_v45  ;;  %v1007_v49 = vunpack.i.l.bf16 %v1006_v45  ;;  %633 = vmatpush.msra.mxu0 %v1445_v39  ;;  %689 = vmatpush.msrb.mxu3 %v1289_v51  ;;  %v591_v51 = vld [vmem:[%s1603_s2 + $0x130] sm:$0xff] }
  0xb6   : > { %522 = vmatpush.msrb.mxu1 %v320_v6 }
  0xb7   : > { %v269_v53 = vsel %vm266_vm7, %v1007_v49, %v1008_v46  ;;  %v268_v54 = vsel %vm266_vm7, %v983_v60, %v1007_v49  ;;  %634 = vmatpush.msra.mxu0 %v1469_v55  ;;  %690 = vmatpush.msrb.mxu3 %v1305_v57  ;;  %v589_v57 = vld [vmem:[%s1603_s2 + $0x120] sm:$0xff]  ;;  %v587_v60 = vld [vmem:[%s1603_s2 + $0x110] sm:$0xff] }
  0xb8   : > { %523 = vmatpush.msrb.mxu1 %v294_v33  ;;  %544 = vmatpush.msra.mxu2 %v269_v53 }
  0xb9   : > { %635 = vmatpush.msra.mxu0 %v570_v58  ;;  %691 = vmatpush.msrb.mxu3 %v1319_v63 }
  0xba   : > { %524 = vmatpush.msrb.mxu1 %v268_v54  ;;  %545 = vmatpush.msra.mxu2 %v1173_v3  ;;  %v600_v3 = vld [vmem:[%s1603_s2 + $0x178] sm:$0xff] }
  0xbb   : > { %875 = vmatmul.msk.f32.vlgmr.msra.gmra.mxu2 %vm486_vm8, %v1336_v10  ;;  %692 = vmatpush.msrb.mxu3 %v1343_v14 }
  0xbc   : > { %525 = vmatpush.msrb.mxu1 %v1169_v1  ;;  %666 = vmatpush.msrb.mxu2 %v1229_v35  ;;  %v599_v1 = vld [vmem:[%s1603_s2 + $0x170] sm:$0xff]  ;;  %v569_v35 = vld [vmem:[%s1603_s2 + $0x80] sm:$0xff] }
  0xbd   : > { %874 = vmatmul.msk.f32.vlgmr.msrb.gmra.mxu1 %vm486_vm8, %v1336_v10  ;;  %636 = vmatpush.msra.mxu0 %v569_v35 }
  0xbe   : > { %667 = vmatpush.msrb.mxu2 %v1234_v36  ;;  %641 = vmatpush.msra.mxu1 %v600_v3  ;;  %v598_v36 = vld [vmem:[%s1603_s2 + $0x168] sm:$0xff] }
  0xbf   : > { %706 = vmatpush.msrb.mxu0 %v600_v3  ;;  %693 = vmatpush.msrb.mxu3 %v1360_v0 }
  0xc0   : > { %668 = vmatpush.msrb.mxu2 %v1249_v42  ;;  %642 = vmatpush.msra.mxu1 %v599_v1  ;;  %v596_v42 = vld [vmem:[%s1603_s2 + $0x158] sm:$0xff] }
  0xc1   : > { %707 = vmatpush.msrb.mxu0 %v599_v1  ;;  %694 = vmatpush.msrb.mxu3 %v1383_v20 }
  0xc2   : > { %669 = vmatpush.msrb.mxu2 %v1270_v47  ;;  %643 = vmatpush.msra.mxu1 %v598_v36  ;;  %v594_v47 = vld [vmem:[%s1603_s2 + $0x148] sm:$0xff] }
  0xc3   : > { %708 = vmatpush.msrb.mxu0 %v598_v36  ;;  %695 = vmatpush.msrb.mxu3 %v1399_v18 }
  0xc4   : > { %670 = vmatpush.msrb.mxu2 %v1284_v50  ;;  %644 = vmatpush.msra.mxu1 %v597_v41  ;;  %v592_v50 = vld [vmem:[%s1603_s2 + $0x138] sm:$0xff] }
  0xc5   : > { %709 = vmatpush.msrb.mxu0 %v597_v41  ;;  %696 = vmatpush.msrb.mxu3 %v1415_v23 }
  0xc6   : > { %671 = vmatpush.msrb.mxu2 %v1300_v56  ;;  %645 = vmatpush.msra.mxu1 %v596_v42  ;;  %v590_v56 = vld [vmem:[%s1603_s2 + $0x128] sm:$0xff] }
  0xc7   : > { %710 = vmatpush.msrb.mxu0 %v596_v42  ;;  %697 = vmatpush.msrb.mxu3 %v1430_v26 }
  0xc8   : > { %672 = vmatpush.msrb.mxu2 %v1314_v62  ;;  %646 = vmatpush.msra.mxu1 %v595_v43  ;;  %v585_v62 = vld [vmem:[%s1603_s2 + $0x100] sm:$0xff] }
  0xc9   : > { %711 = vmatpush.msrb.mxu0 %v595_v43  ;;  %698 = vmatpush.msrb.mxu3 %v1445_v39 }
  0xca   : > { %673 = vmatpush.msrb.mxu2 %v1331_v8  ;;  %647 = vmatpush.msra.mxu1 %v594_v47 }
  0xcb   : > { %712 = vmatpush.msrb.mxu0 %v594_v47  ;;  %699 = vmatpush.msrb.mxu3 %v1469_v55 }
  0xcc   : > { %674 = vmatpush.msrb.mxu2 %v1354_v19  ;;  %648 = vmatpush.msra.mxu1 %v593_v48 }
  0xcd   : > { %713 = vmatpush.msrb.mxu0 %v593_v48  ;;  %700 = vmatpush.msrb.mxu3 %v570_v58 }
  0xce   : > { %675 = vmatpush.msrb.mxu2 %v1374_v30  ;;  %649 = vmatpush.msra.mxu1 %v592_v50 }
  0xcf   : > { %714 = vmatpush.msrb.mxu0 %v592_v50  ;;  %701 = vmatpush.msrb.mxu3 %v569_v35 }
  0xd0   : > { %676 = vmatpush.msrb.mxu2 %v1390_v37  ;;  %650 = vmatpush.msra.mxu1 %v591_v51 }
  0xd1   : > { %715 = vmatpush.msrb.mxu0 %v591_v51 }
  0xd2   : > { %677 = vmatpush.msrb.mxu2 %v1405_v40  ;;  %651 = vmatpush.msra.mxu1 %v590_v56 }
  0xd3   : > { %716 = vmatpush.msrb.mxu0 %v590_v56 }
  0xd4   : > { %678 = vmatpush.msrb.mxu2 %v1420_v44  ;;  %652 = vmatpush.msra.mxu1 %v589_v57 }
  0xd5   : > { %717 = vmatpush.msrb.mxu0 %v589_v57 }
  0xd6   : > { %679 = vmatpush.msrb.mxu2 %v1435_v52  ;;  %653 = vmatpush.msra.mxu1 %v588_v59 }
  0xd7   : > { %718 = vmatpush.msrb.mxu0 %v588_v59 }
  0xd8   : > { %680 = vmatpush.msrb.mxu2 %v1454_v22  ;;  %654 = vmatpush.msra.mxu1 %v587_v60 }
  0xd9   : > { %719 = vmatpush.msrb.mxu0 %v587_v60 }
  0xda   : > { %681 = vmatpush.msrb.mxu2 %v1464_v29  ;;  %655 = vmatpush.msra.mxu1 %v586_v61 }
  0xdb   : > { %720 = vmatpush.msrb.mxu0 %v586_v61 }
  0xdc   : > { %656 = vmatpush.msra.mxu1 %v585_v62 }
  0xdd   : > { %721 = vmatpush.msrb.mxu0 %v585_v62 }
 0x128   : > { %v507_v63 = vpop.f32.mrf.mxu1 }
 0x129   : > { %550 = vst [vmem:[%s218_s13] sm:$0xff] %v507_v63  ;;  %v663_v2 = vmul.f32 %v507_v63, %v507_v63  ;;  %617 = vmatmul.f32.vlgmr.msra.gmra.mxu3 %v507_v63 }
 0x12b   : > { %682 = vmatmul.f32.vlgmr.msrb.gmra.mxu2 %v663_v2 }
 0x13a   : > { %v527_v4 = vpop.f32.mrf.mxu1 }
 0x13b   : > { %551 = vst [vmem:[%s218_s13 + $0x8] sm:$0xff] %v527_v4  ;;  %v664_v5 = vmul.f32 %v527_v4, %v527_v4  ;;  %637 = vmatmul.f32.vlgmr.msra.gmra.mxu0 %v527_v4 }
 0x13d   : > { %702 = vmatmul.f32.vlgmr.msrb.gmra.mxu3 %v664_v5 }
 0x13e   : > { %v547_v8 = vpop.f32.mrf.mxu2 }
 0x13f   : > { %552 = vst [vmem:[%s218_s13 + $0x10] sm:$0xff] %v547_v8  ;;  %v665_v10 = vmul.f32 %v547_v8, %v547_v8  ;;  %657 = vmatmul.f32.vlgmr.msra.gmra.mxu1 %v547_v8 }
 0x143   : > { %722 = vmatmul.f32.vlgmr.msrb.gmra.mxu0 %v665_v10 }
 0x144   : > { %1036 = shalt.err (!%p1033_p3)
}
 0x145   : > { %882 = dma.vmem_to_hbm [thread:$0]  (%p1149_p5), %s750_s23, 384, %s752_s25, %s728_s26   ;;  %vm661_vm9 = vcmask 7168  }
 0x146   : > { %s871_s11 = sshll.u32 %s1161_s30, 3 }
 0x147   : > { %s239_s15 = scalar_lea.vmem %s1605_s4, %s871_s11  ;;  %s243_s17 = scalar_lea.vmem %s1606_s5, %s871_s11 }
 0x1ac   : > { %v618_v14 = vpop.f32.mrf.mxu3 }
 0x1ae   : > { %v683_v7 = vpop.f32.mrf.mxu2 }
 0x1b8   : > { %v638_v15 = vpop.f32.mrf.mxu0 }
 0x1b9   : > { %v639_v19 = vadd.f32 %v638_v15, %v618_v14 }
 0x1bc   : > { %v658_v21 = vpop.f32.mrf.mxu1 }
 0x1bd   : > { %v659_v0 = vadd.f32 %v658_v21, %v639_v19 }
 0x1bf   : > { %662 = vst.msk [vmem:[%s239_s15] sm:$0xff] %vm661_vm9, %v659_v0 }
 0x1c0   : > { %v703_v24 = vpop.f32.mrf.mxu3  ;;  %v723_v11 = vpop.f32.mrf.mxu0 }
 0x1c1   : > { %v704_v9 = vadd.f32 %v703_v24, %v683_v7 }
 0x1c3   : > { %v724_v13 = vadd.f32 %v723_v11, %v704_v9 }
 0x1c5   : > { %726 = vst.msk [vmem:[%s243_s17] sm:$0xff] %vm661_vm9, %v724_v13 }
 0x1c6 PF: > { %p888_p4 = scmp.ge.s32.totalorder %s1071_s21, 2  ;;  %s769_s30 = sand.u32 1, %s1059_s18  }
 0x1c7   : > { %s770_s23 = scalar_lea.sflag [#allocation4], %s769_s30 }
 0x1c8   : > { %p885_p5 = pnand %p888_p4, %p1153_p6 }
 0x1ca   : > { %p886_p7 = pneg %p885_p5 }
 0x1cc   : > { %1054 = dma.done.wait (%p886_p7), %s770_s23, 384  }
 0x1cd   : > { %1056 = vsyncadd (%p886_p7), %s770_s23, 4294966912  ;;  %p16_p8 = scmp.ge.s32.totalorder %s1136_s24, 4   ;;  %s1609_s18 = smov %s1063_s19 }
 0x1ce   : > { %s1610_s19 = smov %s1067_s20  ;;  %s1611_s20 = smov %s1147_s27 }
 0x1cf   : > { %s1612_s21 = smov %s1136_s24  ;;  %18 = sbr.rel (!%p16_p8) target bundleno = 3 (0x3), region = 91 }
 0x1d4   :  { %790 = vsyncpa [#allocation4], 1 }
 0x1d5   :  { %792 = vsyncpa [#allocation4 + $0x1], 1 }

</bundles_post_ra>
